<compile_context>
chip_gen: v7x
topology: tpu7x:2x2x1
jax: 0.10.0
libtpu: 0.0.40
codegen_flags: <defaults>
</compile_context>

<pallas_src>
import functools

import jax
import jax.numpy as jnp
from jax.experimental import pallas as pl
from jax.experimental.pallas import tpu as pltpu


# ---------------------------------------------------------------------------
# Generation-aware VMEM budgets.
# ---------------------------------------------------------------------------
def _device_budgets():
    """v5e/v6e have 128 MiB physical VMEM; v7x has 64 MiB. Pick scoped-VMEM limit
    and per-tile byte budget (pass 2 keeps 4 tiles in flight: 2 in + 2 out)."""
    try:
        vmem_cap = pltpu.get_tpu_info().vmem_capacity_bytes
    except Exception:
        vmem_cap = 64 * 1024 * 1024          # conservative (v7x-sized) fallback
    if vmem_cap >= 100 * 1024 * 1024:        # v5e / v6e
        return {"vmem_limit": 64 << 20, "tile_budget": 8 << 20}
    # v7x: leave headroom so 4 in-flight tiles never spill.
    return {"vmem_limit": 40 << 20, "tile_budget": 6 << 20}


def _choose_hw_tile(hw, c, itemsize, *, tile_budget_bytes, max_lanes=None):
    """Lane-dense HW tile: multiple of 128 lanes, sized by the per-tile byte budget
    (the byte budget, not a lane cap, is the binding constraint)."""
    t = (tile_budget_bytes // max(1, c * itemsize)) // 128 * 128
    t = max(128, int(t))
    if max_lanes is not None:
        t = min(t, max(128, int(max_lanes) // 128 * 128))
    if hw <= t:
        return hw                            # full extent is always a legal block shape
    return t


# ---------------------------------------------------------------------------
# Fused single-pass kernel: grid = (B,), whole (1, C, HW) slab resident.
# Reads x once, writes out once (2N HBM bytes total).
# ---------------------------------------------------------------------------
def _fused_kernel(x_ref, w1_ref, w2_ref, o_ref, *, hw_total):
    x = x_ref[...]                                        # (1, C, HW), native dtype

    # Pooling: f32 accumulation for the sum; max is exact in the native dtype.
    s = jnp.sum(x, axis=-1, dtype=jnp.float32)            # (1, C)
    mx = jnp.max(x, axis=-1).astype(jnp.float32)          # (1, C)
    avg = s * (1.0 / hw_total)

    # Batched 2-layer MLP: one matmul per layer for both pooled vectors.
    pooled = jnp.concatenate([avg, mx], axis=0)           # (2, C)
    w1 = w1_ref[...].astype(jnp.float32)                  # (C, C//r)
    w2 = w2_ref[...].astype(jnp.float32)                  # (C//r, C)
    h = jnp.maximum(jnp.dot(pooled, w1, preferred_element_type=jnp.float32), 0.0)
    y = jnp.dot(h, w2, preferred_element_type=jnp.float32)            # (2, C)
    v = jax.nn.sigmoid(y[0:1, :] + y[1:2, :])              # (1, C)

    o_ref[...] = x * v[:, :, None].astype(x.dtype)


# ---------------------------------------------------------------------------
# Two-pass fallback, pass 1: pooled gate. grid = (B, T); T is a reduction.
# ---------------------------------------------------------------------------
def _gate_kernel(x_ref, w1_ref, w2_ref, gate_ref, sum_acc, max_acc,
                 *, hw_total, hw_tile, needs_mask):
    t = pl.program_id(1)
    last = pl.num_programs(1) - 1

    @pl.when(t == 0)
    def _init():
        sum_acc[...] = jnp.zeros_like(sum_acc)
        max_acc[...] = jnp.full_like(max_acc, -jnp.inf)

    x = x_ref[...]                                        # (1, C, hw_tile), native dtype

    if needs_mask:
        # Fast unmasked path for every full tile; mask only the final partial tile.
        @pl.when(t != last)
        def _full_tile():
            sum_acc[...] += jnp.sum(x, axis=-1, dtype=jnp.float32)
            max_acc[...] = jnp.maximum(max_acc[...],
                                       jnp.max(x, axis=-1).astype(jnp.float32))

        @pl.when(t == last)
        def _partial_tile():
            lane = jax.lax.broadcasted_iota(jnp.int32, (1, 1, hw_tile), 2)
            valid = (t * hw_tile + lane) < hw_total
            xf = x.astype(jnp.float32)
            sum_acc[...] += jnp.sum(jnp.where(valid, xf, 0.0), axis=-1)
            max_acc[...] = jnp.maximum(
                max_acc[...], jnp.max(jnp.where(valid, xf, -jnp.inf), axis=-1))
    else:
        sum_acc[...] += jnp.sum(x, axis=-1, dtype=jnp.float32)
        max_acc[...] = jnp.maximum(max_acc[...],
                                   jnp.max(x, axis=-1).astype(jnp.float32))

    @pl.when(t == last)
    def _finalize():
        w1 = w1_ref[...].astype(jnp.float32)              # (C, C//r)
        w2 = w2_ref[...].astype(jnp.float32)              # (C//r, C)
        avg = sum_acc[...] * (1.0 / hw_total)
        pooled = jnp.concatenate([avg, max_acc[...]], axis=0)          # (2, C)
        h = jnp.maximum(jnp.dot(pooled, w1, preferred_element_type=jnp.float32), 0.0)
        y = jnp.dot(h, w2, preferred_element_type=jnp.float32)         # (2, C)
        v = jax.nn.sigmoid(y[0:1, :] + y[1:2, :])          # (1, C)
        gate_ref[...] = v[:, :, None]                      # (1, C, 1)


# ---------------------------------------------------------------------------
# Two-pass fallback, pass 2: tile-wise rescale in the native dtype.
# ---------------------------------------------------------------------------
def _rescale_kernel(x_ref, gate_ref, o_ref):
    x = x_ref[...]                                        # (1, C, hw_tile), native dtype
    v = gate_ref[...].astype(x.dtype)                     # (1, C, 1)
    o_ref[...] = x * v


# ---------------------------------------------------------------------------
# Wrapper with fused/two-pass dispatch.
# ---------------------------------------------------------------------------
def channel_attention(x, w1, w2, *, donate_x=False, allow_fused=True, max_hw_tile=None):
    """x: (B, C, H, W); w1: (C, C//r); w2: (C//r, C) (stored as (in, out), kernel does z @ W).

    donate_x:    only set True if the caller actually donates x; otherwise XLA inserts
                 a defensive copy and the in-place alias becomes a regression.
    allow_fused: set False to force the two-pass path (testing / huge HW).
    max_hw_tile: optional lane cap for the two-pass path (testing).
    """
    b, c, h, w = x.shape
    hw = h * w
    x_flat = x.reshape(b, c, hw)                          # spatial axis -> lane dimension
    itemsize = jnp.dtype(x.dtype).itemsize
    cr = w1.shape[1]

    budgets = _device_budgets()
    vmem_limit = budgets["vmem_limit"]
    w_bytes = w1.size * jnp.dtype(w1.dtype).itemsize + w2.size * jnp.dtype(w2.dtype).itemsize
    alias = {0: 0} if donate_x else {}

    # Fused-path feasibility: 2x in + 2x out pipelined slabs, one f32 temp for the
    # sum reduction, resident weights, ~2 MiB headroom.
    slab_bytes = c * hw * itemsize
    fused_bytes = 4 * slab_bytes + c * hw * 4 + 2 * w_bytes + (2 << 20)
    use_fused = allow_fused and (max_hw_tile is None) and (fused_bytes <= vmem_limit)

    if use_fused:
        out_flat = pl.pallas_call(
            functools.partial(_fused_kernel, hw_total=hw),
            out_shape=jax.ShapeDtypeStruct((b, c, hw), x.dtype),
            grid_spec=pltpu.PrefetchScalarGridSpec(
                num_scalar_prefetch=0,
                grid=(b,),
                in_specs=[
                    pl.BlockSpec((1, c, hw), lambda bi: (bi, 0, 0)),
                    pl.BlockSpec((c, cr), lambda bi: (0, 0)),
                    pl.BlockSpec((cr, c), lambda bi: (0, 0)),
                ],
                out_specs=pl.BlockSpec((1, c, hw), lambda bi: (bi, 0, 0)),
            ),
            compiler_params=pltpu.CompilerParams(
                dimension_semantics=("parallel",),
                vmem_limit_bytes=vmem_limit,
            ),
            cost_estimate=pl.CostEstimate(
                flops=3 * b * c * hw + 8 * b * c * cr,
                transcendentals=b * c,
                bytes_accessed=2 * b * c * hw * itemsize + 2 * w_bytes,
            ),
            input_output_aliases=alias,
        )(x_flat, w1, w2)
        return out_flat.reshape(b, c, h, w)

    # ---------------- two-pass fallback (large HW) ----------------
    hw_tile = _choose_hw_tile(hw, c, itemsize,
                              tile_budget_bytes=budgets["tile_budget"],
                              max_lanes=max_hw_tile)
    num_t = pl.cdiv(hw, hw_tile)
    needs_mask = (hw % hw_tile) != 0

    # pass 1: pooled gate (B, C, 1), f32
    gate = pl.pallas_call(
        functools.partial(_gate_kernel, hw_total=hw, hw_tile=hw_tile,
                          needs_mask=needs_mask),
        out_shape=jax.ShapeDtypeStruct((b, c, 1), jnp.float32),
        grid_spec=pltpu.PrefetchScalarGridSpec(
            num_scalar_prefetch=0,
            grid=(b, num_t),
            in_specs=[
                pl.BlockSpec((1, c, hw_tile), lambda bi, ti: (bi, 0, ti)),
                pl.BlockSpec((c, cr), lambda bi, ti: (0, 0)),
                pl.BlockSpec((cr, c), lambda bi, ti: (0, 0)),
            ],
            out_specs=pl.BlockSpec((1, c, 1), lambda bi, ti: (bi, 0, 0)),
            scratch_shapes=[pltpu.VMEM((1, c), jnp.float32),
                            pltpu.VMEM((1, c), jnp.float32)],
        ),
        compiler_params=pltpu.CompilerParams(
            dimension_semantics=("parallel", "arbitrary"),
            vmem_limit_bytes=vmem_limit,
        ),
        cost_estimate=pl.CostEstimate(
            flops=2 * b * c * hw + 8 * b * c * cr,
            transcendentals=b * c,
            bytes_accessed=b * c * hw * itemsize + 2 * w_bytes + b * c * 4,
        ),
    )(x_flat, w1, w2)

    # pass 2: rescale every x tile by the resident gate (native dtype).
    # TODO(synk): if profiling shows exposed DMA, try pipeline_mode=pl.Buffered(3) on x.
    out_flat = pl.pallas_call(
        _rescale_kernel,
        out_shape=jax.ShapeDtypeStruct((b, c, hw), x.dtype),
        grid_spec=pltpu.PrefetchScalarGridSpec(
            num_scalar_prefetch=0,
            grid=(b, num_t),
            in_specs=[
                pl.BlockSpec((1, c, hw_tile), lambda bi, ti: (bi, 0, ti)),
                pl.BlockSpec((1, c, 1), lambda bi, ti: (bi, 0, 0)),
            ],
            out_specs=pl.BlockSpec((1, c, hw_tile), lambda bi, ti: (bi, 0, ti)),
        ),
        compiler_params=pltpu.CompilerParams(
            dimension_semantics=("parallel", "parallel"),
            vmem_limit_bytes=vmem_limit,
        ),
        cost_estimate=pl.CostEstimate(
            flops=b * c * hw,
            transcendentals=0,
            bytes_accessed=2 * b * c * hw * itemsize + b * c * 4,
        ),
        input_output_aliases=alias,
    )(x_flat, gate)

    return out_flat.reshape(b, c, h, w)


def channel_attention_ref(x, w1, w2):
    """Plain-JAX reference mirroring the PyTorch module."""
    xf = x.astype(jnp.float32)
    avg_x = jnp.mean(xf, axis=(2, 3))
    max_x = jnp.max(xf, axis=(2, 3))

    def mlp(z):
        return jnp.maximum(z @ w1.astype(jnp.float32), 0.0) @ w2.astype(jnp.float32)

    v = jax.nn.sigmoid(mlp(avg_x) + mlp(max_x))
    return xf * v[:, :, None, None]


if __name__ == "__main__":
    # ---- 1. small shapes matching the module spec (fused path) ----
    B, C, H, W = 2, 4, 16, 16
    ratio = 2
    Cr = C // ratio

    key = jax.random.PRNGKey(0)
    kx, k1, k2 = jax.random.split(key, 3)
    x = jax.random.normal(kx, (B, C, H, W), dtype=jnp.float32)
    w1 = jax.random.normal(k1, (C, Cr), dtype=jnp.float32) * 0.5
    w2 = jax.random.normal(k2, (Cr, C), dtype=jnp.float32) * 0.5

    out = jax.block_until_ready(channel_attention(x, w1, w2))
    ref = channel_attention_ref(x, w1, w2)
    assert out.shape == (B, C, H, W)
    assert jnp.allclose(out, ref, atol=1e-5, rtol=1e-5), "mismatch vs reference (fused)"

    # ---- 2. two-pass fallback with a masked partial last tile ----
    B2, C2, H2, W2 = 2, 8, 48, 48           # HW = 2304 -> 2048 + partial 256-lane tile
    k3, k4, k5 = jax.random.split(jax.random.PRNGKey(1), 3)
    x2 = jax.random.normal(k3, (B2, C2, H2, W2), dtype=jnp.float32)
    w1b = jax.random.normal(k4, (C2, C2 // 2), dtype=jnp.float32) * 0.3
    w2b = jax.random.normal(k5, (C2 // 2, C2), dtype=jnp.float32) * 0.3

    out2 = jax.block_until_ready(
        channel_attention(x2, w1b, w2b, allow_fused=False, max_hw_tile=2048))
    ref2 = channel_attention_ref(x2, w1b, w2b)
    assert jnp.allclose(out2, ref2, atol=1e-4, rtol=1e-4), "mismatch vs reference (two-pass)"

    # Also exercise the fused path on the same larger input.
    out2f = jax.block_until_ready(channel_attention(x2, w1b, w2b))
    assert jnp.allclose(out2f, ref2, atol=1e-4, rtol=1e-4), "mismatch vs reference (fused, large)"

    # ---- 3. bf16 activations (native-dtype rescale / max, f32 pooling sum) ----
    x_bf = x.astype(jnp.bfloat16)
    out_bf = jax.block_until_ready(channel_attention(x_bf, w1, w2))
    ref_bf = channel_attention_ref(x_bf, w1, w2)
    assert out_bf.dtype == jnp.bfloat16
    assert jnp.allclose(out_bf.astype(jnp.float32), ref_bf, atol=5e-2, rtol=5e-2), \
        "mismatch vs reference (bf16)"

    print("KERNEL_OK")
</pallas_src>

<mosaic_0001>
module attributes {stable_mosaic.version = 11 : i64} {
  func.func @_fused_kernel(%arg0: i32, %arg1: memref<1x4x256xf32, #tpu.memory_space<vmem>>, %arg2: memref<4x2xf32, #tpu.memory_space<vmem>>, %arg3: memref<2x4xf32, #tpu.memory_space<vmem>>, %arg4: memref<1x4x256xf32, #tpu.memory_space<vmem>>) attributes {dimension_semantics = [#tpu.dimension_semantics<parallel>], iteration_bounds = array<i64: 2>, scalar_prefetch = 0 : i64, scratch_operands = 0 : i64, tpu.core_type = #tpu.core_type<tc>, window_params = [{transform_indices = @transform_0, window_bounds = array<i64: 1, 4, 256>}, {pipeline_mode = #tpu.pipeline_mode<synchronous>, transform_indices = @transform_1, window_bounds = array<i64: 4, 2>}, {pipeline_mode = #tpu.pipeline_mode<synchronous>, transform_indices = @transform_2, window_bounds = array<i64: 2, 4>}, {transform_indices = @transform_3, window_bounds = array<i64: 1, 4, 256>}]} {
    %c0 = arith.constant 0 : index
    %c0_0 = arith.constant 0 : index
    %c0_1 = arith.constant 0 : index
    %0 = vector.load %arg1[%c0, %c0_0, %c0_1] : memref<1x4x256xf32, #tpu.memory_space<vmem>>, vector<1x4x256xf32>
    %cst = arith.constant dense<0.000000e+00> : vector<1x4xf32>
    %1 = vector.multi_reduction <add>, %0, %cst [2] : vector<1x4x256xf32> to vector<1x4xf32>
    %cst_2 = arith.constant dense<0xFF800000> : vector<1x4xf32>
    %2 = vector.multi_reduction <maximumf>, %0, %cst_2 [2] : vector<1x4x256xf32> to vector<1x4xf32>
    %cst_3 = arith.constant 3.906250e-03 : f32
    %3 = vector.broadcast %cst_3 : f32 to vector<1x4xf32>
    %4 = arith.mulf %1, %3 : vector<1x4xf32>
    %5 = tpu.concatenate %4, %2 in 0 : vector<1x4xf32>, vector<1x4xf32> -> vector<2x4xf32>
    %c0_4 = arith.constant 0 : index
    %c0_5 = arith.constant 0 : index
    %6 = vector.load %arg2[%c0_4, %c0_5] : memref<4x2xf32, #tpu.memory_space<vmem>>, vector<4x2xf32>
    %c0_6 = arith.constant 0 : index
    %c0_7 = arith.constant 0 : index
    %7 = vector.load %arg3[%c0_6, %c0_7] : memref<2x4xf32, #tpu.memory_space<vmem>>, vector<2x4xf32>
    %cst_8 = arith.constant dense<0.000000e+00> : vector<2x2xf32>
    %8 = tpu.matmul %5, %6, %cst_8 {dimension_numbers = #tpu.dot_dimension_numbers<[1], [0], [0], [1], [0, 0, 1, 1], [], []>} : vector<2x4xf32>, vector<4x2xf32>, vector<2x2xf32> -> vector<2x2xf32>
    %cst_9 = arith.constant 0.000000e+00 : f32
    %9 = vector.broadcast %cst_9 : f32 to vector<2x2xf32>
    %10 = arith.maximumf %8, %9 : vector<2x2xf32>
    %cst_10 = arith.constant dense<0.000000e+00> : vector<2x4xf32>
    %11 = tpu.matmul %10, %7, %cst_10 {dimension_numbers = #tpu.dot_dimension_numbers<[1], [0], [0], [1], [0, 0, 1, 1], [], []>} : vector<2x2xf32>, vector<2x4xf32>, vector<2x4xf32> -> vector<2x4xf32>
    %12 = vector.extract_strided_slice %11 {offsets = [0, 0], sizes = [1, 4], strides = [1, 1]} : vector<2x4xf32> to vector<1x4xf32>
    %13 = vector.extract_strided_slice %11 {offsets = [1, 0], sizes = [1, 4], strides = [1, 1]} : vector<2x4xf32> to vector<1x4xf32>
    %14 = arith.addf %12, %13 : vector<1x4xf32>
    %15 = arith.negf %14 : vector<1x4xf32>
    %16 = math.exp %15 : vector<1x4xf32>
    %cst_11 = arith.constant 1.000000e+00 : f32
    %17 = vector.broadcast %cst_11 : f32 to vector<1x4xf32>
    %18 = arith.addf %17, %16 : vector<1x4xf32>
    %19 = arith.divf %17, %18 : vector<1x4xf32>
    %20 = vector.shape_cast %19 : vector<1x4xf32> to vector<1x4x1xf32>
    %21 = vector.broadcast %20 : vector<1x4x1xf32> to vector<1x4x256xf32>
    %22 = arith.mulf %0, %21 : vector<1x4x256xf32>
    %c0_12 = arith.constant 0 : index
    %c0_13 = arith.constant 0 : index
    %c0_14 = arith.constant 0 : index
    %23 = vector.load %arg4[%c0_12, %c0_13, %c0_14] : memref<1x4x256xf32, #tpu.memory_space<vmem>>, vector<1x4x256xf32>
    tpu.vector_store %arg4[%c0_12, %c0_13, %c0_14], %22 {strides = array<i32>} : memref<1x4x256xf32, #tpu.memory_space<vmem>>, vector<1x4x256xf32>,
    return
  }
  func.func @transform_0(%arg0: i32) -> (i32, i32, i32) {
    %c0_i32 = arith.constant 0 : i32
    %c0_i32_0 = arith.constant 0 : i32
    %c0_i32_1 = arith.constant 0 : i32
    return %arg0, %c0_i32, %c0_i32_0 : i32, i32, i32
  }
  func.func @transform_1(%arg0: i32) -> (i32, i32) {
    %c0_i32 = arith.constant 0 : i32
    %c0_i32_0 = arith.constant 0 : i32
    %c0_i32_1 = arith.constant 0 : i32
    return %c0_i32, %c0_i32_0 : i32, i32
  }
  func.func @transform_2(%arg0: i32) -> (i32, i32) {
    %c0_i32 = arith.constant 0 : i32
    %c0_i32_0 = arith.constant 0 : i32
    %c0_i32_1 = arith.constant 0 : i32
    return %c0_i32, %c0_i32_0 : i32, i32
  }
  func.func @transform_3(%arg0: i32) -> (i32, i32, i32) {
    %c0_i32 = arith.constant 0 : i32
    %c0_i32_0 = arith.constant 0 : i32
    %c0_i32_1 = arith.constant 0 : i32
    return %arg0, %c0_i32, %c0_i32_0 : i32, i32, i32
  }
}

</mosaic_0001>

<bundles_post_ra>
// kernel: tpu_custom_call.1
= control target key start
LH: loop header
LB: loop body
LE: loop exit
PB: predicated region body
PF: predicated region fallthrough
CT: control target
= control target key end

     0   :  { %8 = vsyncpa [#allocation3], 0  ;;  %s878_s0 = inlined_call_operand.hbm [shape: f32[2,4,256], index: 0, kind: input, shape index: {}]   ;;  %s879_s1 = inlined_call_operand.vmem [shape: f32[4,2], index: 1, kind: input, shape index: {}]   ;;  %s880_s2 = inlined_call_operand.vmem [shape: f32[2,4], index: 2, kind: input, shape index: {}]   ;;  %s881_s3 = inlined_call_operand.hbm [shape: f32[2,4,256], index: 3, kind: output, shape index: {}]  }
   0x1   :  { %10 = vsyncpa [#allocation3 + $0x1], 0 }
   0x2   :  { %11 = vsyncpa [#allocation4], 0 }
   0x3   :  { %13 = vsyncpa [#allocation4 + $0x1], 0  ;;  %s702_s12 = smov 0   ;;  %s704_s13 = smov 0  }
   0x4   :  { %s706_s14 = smov 0   ;;  %s708_s15 = smov 0  }
   0x5 LB: > { %s723_s16 = sadd.s32 4294967295, %s675_s15   ;;  %s490_s17 = sadd.s32 4294967294, %s675_s15   ;;  %s675_s15 = sphi %s708_s15, %s896_s15   ;;  %s671_s14 = sphi %s706_s14, %s895_s14   ;;  %s667_s13 = sphi %s704_s13, %s894_s13   ;;  %s663_s12 = sphi %s702_s12, %s893_s12  }
   0x6   : > { %s727_s18 = sadd.s32 1, %s675_s15   ;;  %s26_s19 = sadd.s32 1, %s671_s14 }
   0x7   : > { %s23_s20 = ssub.s32 %s675_s15, %s727_s18  ;;  %p33_p0 = scmp.ne.s32.totalorder %s671_s14, %s667_s13 }
   0x8   : > { %p24_p1 = scmp.eq.s32.totalorder %s23_s20, 0  ;;  %p34_p2 = scmp.eq.s32.totalorder %s675_s15, 0 }
   0x9   : > { %p39_p3 = scmp.ne.s32.totalorder %s667_s13, %s663_s12  ;;  %p40_p4 = scmp.eq.s32.totalorder %s723_s16, 0 }
   0xa   : > { %s739_s21 = scalar_select %p24_p1, %s671_s14, %s26_s19  }
   0xb   : > { %p741_p5 = por %p34_p2, %p33_p0  ;;  %p745_p6 = por %p40_p4, %p39_p3 }
   0xc   : > { %p105_p7 = scmp.eq.s32.totalorder %s723_s16, 1  ;;  %p111_p8 = scmp.eq.s32.totalorder %s490_s17, 1 }
   0xd   : > { %p537_p10 = scmp.lt.s32.totalorder %s675_s15, 2  ;;  %s137_s26 = sand.u32 1, %s671_s14  }
   0xe   : > { %p752_p11 = por %p105_p7, %p33_p0  ;;  %p756_p12 = por %p111_p8, %p39_p3 }
   0xf   : > { %s509_s27 = sshll.u32 %s675_s15, 7  ;;  %s493_s28 = sshll.u32 %s137_s26, 3 }
  0x10   : > { %s885_s24 = scalar_select %p752_p11, 1, 0 }
  0x11   : > { %s886_s25 = scalar_select %p756_p12, 1, 0 }
  0x12   : > { %s765_s4 = scalar_lea.hbm %s878_s0, %s509_s27  ;;  %s141_s5 = scalar_lea.vmem [#allocation2], %s493_s28 }
  0x13   : > { %s149_s6 = sshll.u32 %s141_s5, 4  ;;  %p769_p13 = pnand %p537_p10, %p741_p5  ;;  %s773_s6 = int_to_ptr.vmem [resolvable:$true] %s149_s6 }
  0x14   : > { %s138_s8 = scalar_lea.sflag [#allocation3], %s137_s26  ;;  %s579_s9 = scalar_lea.hbm %s765_s4, 128 }
  0x15   : > { %p580_p2 = scmp.ne.s32.totalorder %s765_s4, %s579_s9  ;;  %p581_p3 = pneg %p769_p13 }
  0x16   : > { %s584_s17 = scalar_lea.hbm %s878_s0, 256  ;;  %p585_p5 = scmp.lt.u32.totalorder %s765_s4, %s878_s0 }
  0x17   : > { %p582_p4 = pnand %p581_p3, %p580_p2  ;;  %p586_p8 = scmp.lt.u32.totalorder %s584_s17, %s579_s9 }
  0x18   : > { %p588_p9 = scmp.lt.u32.totalorder %s579_s9, %s765_s4 }
  0x19   : > { %p583_p7 = pneg %p582_p4  ;;  %p587_p10 = por %p586_p8, %p585_p5 }
  0x1b   : > { %p589_p0 = por %p588_p9, %p587_p10 }
  0x1d   : > { %p590_p1 = pnand %p589_p0, %p583_p7 }
  0x1f   : > { %593 = shalt.err (!%p590_p1)
}
  0x20   : > { %s594_s22 = scalar_lea.vmem %s773_s6, 128  ;;  %s677_s26 = smov [#allocation2]  }
  0x21   : > { %p595_p2 = scmp.ne.s32.totalorder %s773_s6, %s594_s22  ;;  %s599_s27 = sshll.u32 %s677_s26, 4  ;;  %s600_s27 = int_to_ptr.vmem [resolvable:$false] %s599_s27 }
  0x22   : > { %s601_s28 = scalar_lea.vmem %s600_s27, 256  ;;  %p602_p11 = scmp.lt.s32.totalorder %s773_s6, %s600_s27 }
  0x23   : > { %p597_p4 = pnand %p595_p2, %p581_p3  ;;  %p603_p5 = scmp.lt.s32.totalorder %s601_s28, %s594_s22 }
  0x25   : > { %p598_p12 = pneg %p597_p4  ;;  %p604_p8 = por %p603_p5, %p602_p11 }
  0x27   : > { %p605_p9 = pnand %p604_p8, %p598_p12 }
  0x29   : > { %608 = shalt.err (!%p605_p9)
}
  0x2a   : > { %532 = dma.hbm_to_vmem [thread:$0]  (!%p769_p13), %s765_s4, 128, %s773_s6, %s138_s8  }
  0x2b   : > { %p888_p0 = scmp.lt.s32.totalorder %s675_s15, 3  ;;  %p889_p1 = scmp.ge.s32.totalorder %s675_s15, 1 }
  0x2d   : > { %p155_p3 = pnand %p889_p1, %p888_p0 }
  0x2e   : > { %s807_s29 = sand.u32 (!%p155_p3), 1, %s667_s13  }
  0x2f   : > { %158 = sbr.rel (%p155_p3) target bundleno = 801 (0x321), region = 32  ;;  %s497_s30 = sshll.u32 (!%p155_p3), %s807_s29, 3 }
  0x30   : > { %s161_s5 = scalar_lea.sflag (!%p155_p3), [#allocation3], %s807_s29  ;;  %s164_s7 = scalar_lea.vmem (!%p155_p3), [#allocation2], %s497_s30 }
  0x36   : > { %654 = dma.done.wait (%p745_p6), %s161_s5, 128  }
  0x37   : > { %656 = vsyncadd (%p745_p6), %s161_s5, 4294967168  ;;  %vm191_vm0 = vcmask 1043456   ;;  %v187_v0 = vld [vmem:[%s164_s7] sm:$0xff]  ;;  %v678_v9 = vmov 0.0   ;;  %vm679_vm1 = vmmov 0   ;;  %v204_v10 = vlaneseq  ;;  %s510_s9 = sshll.u32 %s723_s16, 7 }
  0x38   : > { %v189_v1 = vcombine.high %v187_v0, %v187_v0  ;;  %v192_v2 = vsel %vm191_vm0, %v187_v0, 0.0  ;;  %v197_v4 = vsel %vm191_vm0, %v187_v0, -inf  ;;  %v219_v8 = vld [vmem:[%s879_s1] sm:$0xf]  ;;  %515 = vmatprep.subr.mxu0 %v678_v9  ;;  %517 = vmatprep.mubr.msk.f32.mxu0 %vm679_vm1, %v678_v9  ;;  %vm217_vm2 = vcmask 1040384   ;;  %s186_s10 = scalar_lea.vmem [#allocation5], %s497_s30  ;;  %s834_s20 = scalar_lea.hbm %s881_s3, %s510_s9 }
  0x39   : > { %516 = vmatpush3.msk.msra.mxu0 %vm191_vm0, %v219_v8  ;;  %520 = vmatprep.subr.mxu1 %v678_v9  ;;  %v205_v11 = vand.u32 127, %v204_v10  ;;  %v207_v12 = vshrl.u32 %v204_v10, 7  ;;  %vm221_vm3 = vcmask 31744   ;;  %v220_v20 = vld [vmem:[%s880_s2] sm:$0x3]  ;;  %vm303_vm4 = vcmask 1041408  }
  0x3a   : > { %v193_v3 = vsel %vm191_vm0, %v189_v1, 0.0  ;;  %v198_v5 = vsel %vm191_vm0, %v189_v1, -inf  ;;  %522 = vmatprep.mubr.msk.f32.mxu1 %vm679_vm1, %v678_v9  ;;  %521 = vmatpush3.msk.msra.mxu1 %vm303_vm4, %v220_v20  ;;  %vm299_vm5 = vcmask 15360   ;;  %v680_v34 = vmov 839922192   ;;  %s420_s11 = sshll.u32 %s186_s10, 4  ;;  %s836_s11 = int_to_ptr.vmem [resolvable:$true] %s420_s11 }
  0x3b   : > { %v194_v6 = vadd.f32 %v193_v3, %v192_v2  ;;  %v199_v7 = vmax.f32 %v197_v4, %v198_v5  ;;  %v208_v14 = vsub.s32 %v205_v11, %v207_v12  ;;  %v389_v31 = vsub.s32 0, %v207_v12  ;;  %s406_s22 = scalar_lea.sflag [#allocation4], %s807_s29  ;;  %s609_s26 = scalar_lea.vmem %s836_s11, 128 }
  0x3c   : > { %v396_v35 = vunpack.c.l.s4 %v680_v34  ;;  %p610_p6 = scmp.ne.s32.totalorder %s836_s11, %s609_s26  ;;  %p890_p11 = scmp.ne.s32.totalorder %s885_s24, 0 }
  0x3d   : > { %195 = vadd.xlane.f32.xlu0 %v194_v6  ;;  %s681_s16 = smov [#allocation5]  }
  0x3e   : > { %v397_v36 = vunpack.c.0.s8 %v396_v35  ;;  %p611_p12 = pnand %p610_p6, %p890_p11  ;;  %s613_s27 = sshll.u32 %s681_s16, 4  ;;  %s614_s27 = int_to_ptr.vmem [resolvable:$false] %s613_s27 }
  0x3f   : > { %s615_s28 = scalar_lea.vmem %s614_s27, 256  ;;  %p616_p7 = scmp.lt.s32.totalorder %s836_s11, %s614_s27 }
  0x40   : > { %v400_v37 = vsub.s32 %v397_v36, %v207_v12  ;;  %p612_p13 = pneg %p611_p12  ;;  %p617_p10 = scmp.lt.s32.totalorder %s615_s28, %s609_s26 }
  0x41   : > { %200 = vmax.xlane.f32.xlu0 %v199_v7 }
  0x42   : > { %p618_p2 = por %p617_p10, %p616_p7 }
  0x44   : > { %p619_p4 = pnand %p618_p2, %p612_p13 }
  0xca   : > { %v196_v13 = vpop.xlane.xlu0 %195 }
  0xcb   : > { %v202_v15 = vmul.f32 0.00390625, %v196_v13 }
  0xcd   : > { %v209_v17 = vrot.slane %v202_v15, %v208_v14 }
  0xce   : > { %v201_v16 = vpop.xlane.xlu0 %200 }
  0xcf   : > { %v215_v18 = vrot.slane %v201_v16, %v208_v14 }
  0xd1   : > { %v218_v19 = vsel %vm217_vm2, %v209_v17, %v215_v18 }
  0xd2   : > { %518 = vmatmul.mubr.msk.f32.vlgmr.msra.gmra.mrb[0].mxu0 %vm221_vm3, %v218_v19 }
 0x1a5   : > { %v294_v21 = vpop.f32.mrb[0].mxu0 }
 0x1a6   : > { %v298_v22 = vmax.f32 %v294_v21, 0.0  ;;  %v519_v23 = vpop.f32.mrb[1].mxu0 }
 0x1a8   : > { %523 = vmatmul.mubr.msk.f32.vlgmr.msra.gmra.mrb[0].mxu1 %vm299_vm5, %v298_v22 }
 0x27b   : > { %v373_v24 = vpop.f32.mrb[0].mxu1 }
 0x27c   : > { %v378_v25 = vrot.slane %v373_v24, 1  ;;  %v524_v26 = vpop.f32.mrb[1].mxu1 }
 0x27e   : > { %v380_v27 = vadd.f32 %v378_v25, %v373_v24 }
 0x280   : > { %v503_v28 = vmul.f32 -1.442695, %v380_v27 }
 0x282   : > { %575 = vpow2.f32 %v503_v28 }
 0x28c   : > { %v576_v29 = vpop.eup %575 }
 0x28d   : > { %v384_v30 = vadd.f32 1.0, %v576_v29 }
 0x28f   : > { %577 = vrcp.f32 %v384_v30 }
 0x299   : > { %v578_v32 = vpop.eup %577 }
 0x29a   : > { %v390_v33 = vrot.slane %v578_v32, %v389_v31 }
 0x29c   : > { %392 = vbcast.lane.b32.xlu1 %v390_v33, 256 }
 0x30e   : > { %v393_v38 = vpop.permute.xlu1 %392 }
 0x30f   : > { %v401_v39 = vrot.slane %v393_v38, %v400_v37 }
 0x311   : > { %v403_v40 = vmul.f32 %v401_v39, %v187_v0 }
 0x313   : > { %404 = vst [vmem:[%s186_s10] sm:$0xff] %v403_v40 }
 0x314   : > { %622 = shalt.err (!%p619_p4)
}
 0x315   : > { %s623_s29 = scalar_lea.hbm %s834_s20, 128  ;;  %s627_s7 = scalar_lea.hbm %s881_s3, 256 }
 0x316   : > { %p624_p5 = scmp.ne.s32.totalorder %s834_s20, %s623_s29  ;;  %p628_p0 = scmp.lt.u32.totalorder %s834_s20, %s881_s3 }
 0x317   : > { %p629_p1 = scmp.lt.u32.totalorder %s627_s7, %s623_s29  ;;  %p631_p6 = scmp.lt.u32.totalorder %s623_s29, %s834_s20 }
 0x318   : > { %p625_p8 = pnand %p624_p5, %p890_p11 }
 0x319   : > { %p630_p3 = por %p629_p1, %p628_p0 }
 0x31a   : > { %p626_p9 = pneg %p625_p8 }
 0x31b   : > { %p632_p12 = por %p631_p6, %p630_p3 }
 0x31d   : > { %p633_p13 = pnand %p632_p12, %p626_p9 }
 0x31f   : > { %636 = shalt.err (!%p633_p13)
}
 0x320   : > { %527 = dma.vmem_to_hbm [thread:$0]  (%p890_p11), %s836_s11, 128, %s834_s20, %s406_s22  }
 0x321 PF: > { %s432_s23 = sand.u32 1, %s663_s12   ;;  %p891_p7 = scmp.ne.s32.totalorder %s886_s25, 0 }
 0x322   : > { %p892_p10 = scmp.ge.s32.totalorder %s675_s15, 2  ;;  %s433_s8 = scalar_lea.sflag [#allocation4], %s432_s23 }
 0x324   : > { %p534_p2 = pnand %p892_p10, %p891_p7 }
 0x326   : > { %658 = dma.done.wait (!%p534_p2), %s433_s8, 128  }
 0x327   : > { %660 = vsyncadd (!%p534_p2), %s433_s8, 4294967168  ;;  %p16_p4 = scmp.ge.s32.totalorder %s727_s18, 4   ;;  %s893_s12 = smov %s667_s13 }
 0x328   : > { %s894_s13 = smov %s671_s14  ;;  %s895_s14 = smov %s739_s21 }
 0x329   : > { %s896_s15 = smov %s727_s18  ;;  %18 = sbr.rel (!%p16_p4) target bundleno = 5 (0x5), region = 77 }
 0x330   :  { %438 = vsyncpa [#allocation3], 1 }
 0x331   :  { %440 = vsyncpa [#allocation3 + $0x1], 1 }
 0x332   :  { %441 = vsyncpa [#allocation4], 1 }
 0x333   :  { %443 = vsyncpa [#allocation4 + $0x1], 1 }

</bundles_post_ra>
